<compile_context>
chip_gen: v7x
topology: tpu7x:2x2x1
jax: 0.10.0
libtpu: 0.0.40
codegen_flags: <defaults>
</compile_context>

<pallas_src>
import jax
import jax.numpy as jnp
from jax.experimental import pallas as pl
from jax.experimental.pallas import tpu as pltpu


N_PAD = 128      # lane-dense packed weight / output width (assumes actions <= 128)
ROW_ALIGN = 16   # 16-row batch tiles: bf16 sublane packing (v5e) and f32-safe


def _round_up(n, m):
    return (n + m - 1) // m * m


def controller_kernel(x_ref, w_ref, b_ref, o_ref):
    """One batch tile: x @ W_packed + b_packed, then the per-column head.

    w_ref: (latents, 128) pre-composed weight, columns >= actions are zero.
    b_ref: (1, 128)       pre-composed bias,   columns >= actions are zero.
    """
    # Cast activations to the weight dtype (bf16 in production) so the MXU runs
    # at native width; accumulate in f32.
    x = x_ref[...].astype(w_ref.dtype)
    a = jnp.dot(x, w_ref[...], preferred_element_type=jnp.float32) + b_ref[...]

    # Head: col 0 -> tanh, cols 1,2 -> sigmoid, remaining real columns unchanged,
    # padded columns stay zero and are sliced away by the wrapper.
    # Fused into a single EUP pass via tanh(x) = 2*sigmoid(2x) - 1.
    col = jax.lax.broadcasted_iota(jnp.int32, a.shape, dimension=1)
    s = jax.nn.sigmoid(a * jnp.where(col == 0, 2.0, 1.0))
    a = jnp.where(col == 0, 2.0 * s - 1.0,
                  jnp.where((col == 1) | (col == 2), s, a))

    o_ref[...] = a.astype(o_ref.dtype)


def prepare_controller_params(params, actions, compute_dtype=jnp.bfloat16):
    """One-time pre-composition of the 4 Linear layers into a single affine map.

    Do this once per parameter update, not per forward call.
    """
    assert 3 <= actions <= N_PAD, "head writes cols 0..2; packed width is 128"
    (w1, b1), (w2, b2), (w3, b3), (w4, b4) = params
    hp = jax.lax.Precision.HIGHEST

    W = jnp.dot(jnp.dot(jnp.dot(w1, w2, precision=hp), w3, precision=hp),
                w4, precision=hp)                                   # (latents, actions)
    b = jnp.dot(jnp.dot(jnp.dot(b1, w2, precision=hp) + b2, w3, precision=hp) + b3,
                w4, precision=hp) + b4                              # (actions,)

    latents = w1.shape[0]
    Wp = jnp.zeros((latents, N_PAD), jnp.float32).at[:, :actions].set(W)
    Wp = Wp.astype(compute_dtype)
    bp = jnp.zeros((1, N_PAD), jnp.float32).at[0, :actions].set(b)  # bias kept f32
    return Wp, bp


def controller_forward(x, packed, actions, *, batch_tile=1024, out_dtype=None):
    W, b = packed
    batch, latents = x.shape
    assert W.shape == (latents, N_PAD)
    assert 3 <= actions <= N_PAD
    out_dtype = x.dtype if out_dtype is None else out_dtype

    # Batch tiling: large tiles (512-1024 rows reach ~85% of HBM roofline), last
    # tile padding < one tile, and >= 2 tiles for large batches so v7x's two
    # TensorCores both get work (no effect on single-TC v5e/v6e).
    nt = pl.cdiv(batch, batch_tile)
    if nt == 1 and batch >= 512:
        nt = 2
    tile_b = _round_up(pl.cdiv(batch, nt), ROW_ALIGN)
    nt = pl.cdiv(batch, tile_b)

    cost = pl.CostEstimate(
        flops=2 * batch * latents * N_PAD,
        transcendentals=batch * N_PAD,  # one fused sigmoid pass over the slab
        bytes_accessed=int(
            x.size * x.dtype.itemsize
            + W.size * W.dtype.itemsize
            + b.size * b.dtype.itemsize
            + batch * N_PAD * jnp.dtype(out_dtype).itemsize
        ),
    )

    out = pl.pallas_call(
        controller_kernel,
        out_shape=jax.ShapeDtypeStruct((batch, N_PAD), out_dtype),
        grid_spec=pltpu.PrefetchScalarGridSpec(
            num_scalar_prefetch=0,
            grid=(nt,),
            in_specs=[
                # x is the only batch-tiled input (block covers full latents dim).
                pl.BlockSpec((tile_b, latents), lambda i: (i, 0)),
                # Weights/bias: constant block index -> VMEM-resident across tiles.
                pl.BlockSpec(W.shape, lambda i: (0, 0)),
                pl.BlockSpec(b.shape, lambda i: (0, 0)),
            ],
            out_specs=pl.BlockSpec((tile_b, N_PAD), lambda i: (i, 0)),
        ),
        compiler_params=pltpu.CompilerParams(
            dimension_semantics=("parallel",)  # v7x: shard batch tiles across 2 TCs
        ),
        cost_estimate=cost,
    )(x, W, b)

    # Lane-dense (…,128) store inside the kernel; trim lane padding outside.
    return out[:, :actions]


def init_linear(key, fan_in, fan_out):
    """PyTorch nn.Linear default init: U(-1/sqrt(fan_in), 1/sqrt(fan_in))."""
    kw, kb = jax.random.split(key)
    bound = 1.0 / (fan_in ** 0.5)
    w = jax.random.uniform(kw, (fan_in, fan_out), jnp.float32, -bound, bound)
    b = jax.random.uniform(kb, (fan_out,), jnp.float32, -bound, bound)
    return w, b


def reference_forward(x, params):
    """Layer-by-layer pure-JAX reference matching the PyTorch module."""
    (w1, b1), (w2, b2), (w3, b3), (w4, b4) = params
    hp = jax.lax.Precision.HIGHEST
    h = jnp.dot(x, w1, precision=hp) + b1
    h = jnp.dot(h, w2, precision=hp) + b2
    h = jnp.dot(h, w3, precision=hp) + b3
    a = jnp.dot(h, w4, precision=hp) + b4
    a = a.at[:, 0].set(jnp.tanh(a[:, 0]))
    a = a.at[:, 1].set(jax.nn.sigmoid(a[:, 1]))
    a = a.at[:, 2].set(jax.nn.sigmoid(a[:, 2]))
    return a


if __name__ == "__main__":
    batch, latents, actions = 8, 32, 4

    key = jax.random.PRNGKey(0)
    kx, k1, k2, k3, k4 = jax.random.split(key, 5)

    x = jax.random.normal(kx, (batch, latents), dtype=jnp.float32)
    params = (
        init_linear(k1, latents, 128),
        init_linear(k2, 128, 256),
        init_linear(k3, 256, 128),
        init_linear(k4, 128, actions),
    )
    ref = reference_forward(x, params)

    # f32 compute path: tight check against the layer-by-layer reference.
    # (Tolerance accounts for matmul reassociation in the offline pre-compose
    #  and for the TPU MXU's f32 matmul algorithm.)
    packed_f32 = prepare_controller_params(params, actions, jnp.float32)
    out_f32 = jax.block_until_ready(controller_forward(x, packed_f32, actions))
    assert out_f32.shape == (batch, actions)
    assert out_f32.dtype == jnp.float32
    assert jnp.allclose(out_f32, ref, atol=2e-3, rtol=2e-3), "f32 mismatch vs reference"

    # bf16 production path: bf16 weights + bf16 output (halves the dominant HBM streams).
    packed_bf16 = prepare_controller_params(params, actions, jnp.bfloat16)
    out_bf16 = jax.block_until_ready(
        controller_forward(x, packed_bf16, actions, out_dtype=jnp.bfloat16)
    )
    assert out_bf16.shape == (batch, actions)
    assert jnp.allclose(out_bf16.astype(jnp.float32), ref, atol=3e-2, rtol=3e-2), \
        "bf16 mismatch vs reference"

    print("KERNEL_OK")
</pallas_src>

<mosaic_0001>
module attributes {stable_mosaic.version = 11 : i64} {
  func.func @controller_kernel(%arg0: i32, %arg1: memref<16x32xf32, #tpu.memory_space<vmem>>, %arg2: memref<32x128xf32, #tpu.memory_space<vmem>>, %arg3: memref<1x128xf32, #tpu.memory_space<vmem>>, %arg4: memref<16x128xf32, #tpu.memory_space<vmem>>) attributes {dimension_semantics = [#tpu.dimension_semantics<parallel>], iteration_bounds = array<i64: 1>, scalar_prefetch = 0 : i64, scratch_operands = 0 : i64, tpu.core_type = #tpu.core_type<tc>, window_params = [{transform_indices = @transform_0, window_bounds = array<i64: 16, 32>}, {pipeline_mode = #tpu.pipeline_mode<synchronous>, transform_indices = @transform_1, window_bounds = array<i64: 32, 128>}, {pipeline_mode = #tpu.pipeline_mode<synchronous>, transform_indices = @transform_2, window_bounds = array<i64: 1, 128>}, {transform_indices = @transform_3, window_bounds = array<i64: 16, 128>}]} {
    %c0 = arith.constant 0 : index
    %c0_0 = arith.constant 0 : index
    %0 = vector.load %arg1[%c0, %c0_0] : memref<16x32xf32, #tpu.memory_space<vmem>>, vector<16x32xf32>
    %c0_1 = arith.constant 0 : index
    %c0_2 = arith.constant 0 : index
    %1 = vector.load %arg2[%c0_1, %c0_2] : memref<32x128xf32, #tpu.memory_space<vmem>>, vector<32x128xf32>
    %cst = arith.constant dense<0.000000e+00> : vector<16x128xf32>
    %2 = tpu.matmul %0, %1, %cst {dimension_numbers = #tpu.dot_dimension_numbers<[1], [0], [0], [1], [0, 0, 1, 1], [], []>} : vector<16x32xf32>, vector<32x128xf32>, vector<16x128xf32> -> vector<16x128xf32>
    %c0_3 = arith.constant 0 : index
    %c0_4 = arith.constant 0 : index
    %3 = vector.load %arg3[%c0_3, %c0_4] : memref<1x128xf32, #tpu.memory_space<vmem>>, vector<1x128xf32>
    %4 = vector.broadcast %3 : vector<1x128xf32> to vector<16x128xf32>
    %5 = arith.addf %2, %4 : vector<16x128xf32>
    %6 = tpu.iota {dimensions = array<i32: 1>} : vector<16x128xi32>
    %c0_i32 = arith.constant 0 : i32
    %7 = vector.broadcast %c0_i32 : i32 to vector<16x128xi32>
    %8 = arith.cmpi eq, %6, %7 : vector<16x128xi32>
    %cst_5 = arith.constant 2.000000e+00 : f32
    %cst_6 = arith.constant 1.000000e+00 : f32
    %9 = vector.broadcast %cst_5 : f32 to vector<16x128xf32>
    %10 = vector.broadcast %cst_6 : f32 to vector<16x128xf32>
    %11 = arith.select %8, %9, %10 : vector<16x128xi1>, vector<16x128xf32>
    %12 = arith.mulf %5, %11 : vector<16x128xf32>
    %13 = arith.negf %12 : vector<16x128xf32>
    %14 = math.exp %13 : vector<16x128xf32>
    %cst_7 = arith.constant 1.000000e+00 : f32
    %15 = vector.broadcast %cst_7 : f32 to vector<16x128xf32>
    %16 = arith.addf %15, %14 : vector<16x128xf32>
    %17 = arith.divf %15, %16 : vector<16x128xf32>
    %c0_i32_8 = arith.constant 0 : i32
    %18 = vector.broadcast %c0_i32_8 : i32 to vector<16x128xi32>
    %19 = arith.cmpi eq, %6, %18 : vector<16x128xi32>
    %cst_9 = arith.constant 2.000000e+00 : f32
    %20 = vector.broadcast %cst_9 : f32 to vector<16x128xf32>
    %21 = arith.mulf %20, %17 : vector<16x128xf32>
    %cst_10 = arith.constant 1.000000e+00 : f32
    %22 = vector.broadcast %cst_10 : f32 to vector<16x128xf32>
    %23 = arith.subf %21, %22 : vector<16x128xf32>
    %c1_i32 = arith.constant 1 : i32
    %24 = vector.broadcast %c1_i32 : i32 to vector<16x128xi32>
    %25 = arith.cmpi eq, %6, %24 : vector<16x128xi32>
    %c2_i32 = arith.constant 2 : i32
    %26 = vector.broadcast %c2_i32 : i32 to vector<16x128xi32>
    %27 = arith.cmpi eq, %6, %26 : vector<16x128xi32>
    %28 = arith.ori %25, %27 : vector<16x128xi1>
    %29 = arith.select %28, %17, %5 : vector<16x128xi1>, vector<16x128xf32>
    %30 = arith.select %19, %23, %29 : vector<16x128xi1>, vector<16x128xf32>
    %c0_11 = arith.constant 0 : index
    %c0_12 = arith.constant 0 : index
    %31 = vector.load %arg4[%c0_11, %c0_12] : memref<16x128xf32, #tpu.memory_space<vmem>>, vector<16x128xf32>
    tpu.vector_store %arg4[%c0_11, %c0_12], %30 {strides = array<i32>} : memref<16x128xf32, #tpu.memory_space<vmem>>, vector<16x128xf32>,
    return
  }
  func.func @transform_0(%arg0: i32) -> (i32, i32) {
    %c0_i32 = arith.constant 0 : i32
    %c0_i32_0 = arith.constant 0 : i32
    return %arg0, %c0_i32 : i32, i32
  }
  func.func @transform_1(%arg0: i32) -> (i32, i32) {
    %c0_i32 = arith.constant 0 : i32
    %c0_i32_0 = arith.constant 0 : i32
    %c0_i32_1 = arith.constant 0 : i32
    return %c0_i32, %c0_i32_0 : i32, i32
  }
  func.func @transform_2(%arg0: i32) -> (i32, i32) {
    %c0_i32 = arith.constant 0 : i32
    %c0_i32_0 = arith.constant 0 : i32
    %c0_i32_1 = arith.constant 0 : i32
    return %c0_i32, %c0_i32_0 : i32, i32
  }
  func.func @transform_3(%arg0: i32) -> (i32, i32) {
    %c0_i32 = arith.constant 0 : i32
    %c0_i32_0 = arith.constant 0 : i32
    return %arg0, %c0_i32 : i32, i32
  }
}

</mosaic_0001>

<bundles_post_ra>
// kernel: tpu_custom_call.1
= control target key start
LH: loop header
LB: loop body
LE: loop exit
PB: predicated region body
PF: predicated region fallthrough
CT: control target
= control target key end

     0   :  { %8 = vsyncpa [#allocation3], 0  ;;  %s382_s0 = inlined_call_operand.hbm [shape: f32[8,32], index: 0, kind: input, shape index: {}]   ;;  %s383_s1 = inlined_call_operand.hbm [shape: f32[32,128], index: 1, kind: input, shape index: {}]   ;;  %s384_s2 = inlined_call_operand.vmem [shape: f32[1,128], index: 2, kind: input, shape index: {}]   ;;  %s385_s3 = inlined_call_operand.hbm [shape: f32[8,128], index: 3, kind: output, shape index: {}]  }
   0x1   :  { %9 = vsyncpa [#allocation6], 0 }
   0x2   :  { %10 = vsyncpa [#allocation4], 0 }
   0x3   :  { %15 = vsyncadd [#allocation3], 128  ;;  %s305_s12 = smov [#allocation2]   ;;  %s233_s16 = scalar_lea.hbm %s382_s0, 128 }
   0x4   :  { %s16_s13 = sshll.u32 %s305_s12, 4  ;;  %p234_p0 = scmp.ne.s32.totalorder %s382_s0, %s233_s16  ;;  %s17_s13 = int_to_ptr.vmem [resolvable:$true] %s16_s13 }
   0x5   :  { %p237_p1 = scmp.lt.u32.totalorder %s233_s16, %s382_s0 }
   0x7   :  { %p239_p2 = pnand %p237_p1, %p234_p0 }
   0x9   :  { %242 = shalt.err (!%p239_p2)
}
   0xa   :  { %s243_s21 = scalar_lea.vmem %s17_s13, 128  ;;  %s247_s22 = scalar_lea.vmem %s17_s13, 256 }
   0xb   :  { %p244_p3 = scmp.ne.s32.totalorder %s17_s13, %s243_s21  ;;  %p248_p4 = scmp.lt.s32.totalorder %s17_s13, %s17_s13 }
   0xc   :  { %p249_p5 = scmp.lt.s32.totalorder %s247_s22, %s243_s21 }
   0xe   :  { %p250_p6 = por %p249_p5, %p248_p4 }
  0x10   :  { %p251_p7 = pnand %p250_p6, %p244_p3 }
  0x12   :  { %254 = shalt.err (!%p251_p7)
}
  0x13   :  { %s306_s23 = smov 128   ;;  %s307_s24 = smov 8  }
  0x14   :  { %22 = dma.hbm_to_vmem [thread:$0]  %s382_s0, 128, %s17_s13, [#allocation3], %s306_s23, %s306_s23, %s307_s24  }
  0x15   :  { %s308_s27 = smov [#allocation5]   ;;  %s255_s4 = scalar_lea.hbm %s383_s1, 512 }
  0x16   :  { %s28_s28 = sshll.u32 %s308_s27, 4  ;;  %p256_p8 = scmp.ne.s32.totalorder %s383_s1, %s255_s4  ;;  %s29_s28 = int_to_ptr.vmem [resolvable:$true] %s28_s28 }
  0x17   :  { %p259_p9 = scmp.lt.u32.totalorder %s255_s4, %s383_s1 }
  0x19   :  { %p261_p10 = pnand %p259_p9, %p256_p8 }
  0x1b   :  { %264 = shalt.err (!%p261_p10)
}
  0x1c   :  { %s265_s9 = scalar_lea.vmem %s29_s28, 512  ;;  %p270_p12 = scmp.lt.s32.totalorder %s29_s28, %s29_s28 }
  0x1d   :  { %p266_p11 = scmp.ne.s32.totalorder %s29_s28, %s265_s9  ;;  %p271_p13 = scmp.lt.s32.totalorder %s265_s9, %s265_s9 }
  0x1f   :  { %p272_p0 = por %p271_p13, %p270_p12 }
  0x21   :  { %p273_p1 = pnand %p272_p0, %p266_p11 }
  0x23   :  { %276 = shalt.err (!%p273_p1)
}
  0x24   :  { %34 = dma.hbm_to_vmem [thread:$0]  %s383_s1, 512, %s29_s28, [#allocation6], %s306_s23, %s306_s23, %s307_s24  }
  0x25   :  { %299 = dma.done.wait [#allocation3], 256  }
  0x26   :  { %300 = vsyncadd [#allocation3], 4294967040 }
  0x27   :  { %301 = dma.done.wait [#allocation6], 512  }
  0x28   :  { %302 = vsyncadd [#allocation6], 4294966784  ;;  %vm56_vm0 = vcmask 261120   ;;  %v45_v0 = vld [vmem:[#allocation5] sm:$0xff]  ;;  %v46_v1 = vld [vmem:[#allocation5 + $0x8] sm:$0xff]  ;;  %v138_v8 = vlaneseq  ;;  %v309_v12 = vmov 1.0  }
  0x29   :  { %v47_v2 = vld [vmem:[#allocation5 + $0x10] sm:$0xff]  ;;  %v211_v3 = vpack.c.bf16 %v46_v1, %v45_v0  ;;  %v48_v4 = vld [vmem:[#allocation5 + $0x18] sm:$0xff] }
  0x2a   :  { %v43_v5 = vld [vmem:[#allocation2] sm:$0xff]  ;;  %v215_v6 = vpack.c.bf16 %v48_v4, %v47_v2  ;;  %v44_v7 = vld [vmem:[#allocation2 + $0x8] sm:$0xff]  ;;  %v139_v9 = vand.u32 127, %v138_v8 }
  0x2b   :  { %208 = vmatprep.mubr.msk.f32.mxu0 %vm56_vm0, %v43_v5  ;;  %212 = vmatprep.subr.bf16.mxu0 %v211_v3  ;;  %v187_v10 = vld [vmem:[%s384_s2] ss:$0 sm:$0xff] }
  0x2c   :  { %214 = vmatpush3.bf16.msra.mxu0 %v211_v3  ;;  %vm140_vm1 = vcmp.eq.s32.totalorder %v139_v9, 0  ;;  %vm160_vm2 = vcmp.eq.s32.totalorder %v139_v9, 1  ;;  %vm161_vm3 = vcmp.eq.s32.totalorder %v139_v9, 2 }
  0x2d   :  { %216 = vmatprep.subr.bf16.mxu0 %v215_v6  ;;  %v141_v13 = vsel %vm140_vm1, 2.0, %v309_v12  ;;  %vm162_vm4 = vmor %vm160_vm2, %vm161_vm3 }
  0x30   :  { %218 = vmatpush3.bf16.msra.mxu0 %v215_v6 }
  0x33   :  { %209 = vmatmul.mubr.msk.f32.vlgmr.msra.gmra.mrb[0].mxu0 %vm56_vm0, %v44_v7 }
 0x106   :  { %v210_v11 = vpop.f32.mrb[0].mxu0 }
 0x107   :  { %v135_v14 = vadd.f32 %v210_v11, %v187_v10  ;;  %v129_v15 = vpop.f32.mrb[1].mxu0 }
 0x108   :  { %v130_v16 = vadd.f32 %v187_v10, %v129_v15 }
 0x109   :  { %v143_v17 = vmul.f32 %v141_v13, %v135_v14 }
 0x10a   :  { %v142_v18 = vmul.f32 %v141_v13, %v130_v16 }
 0x10b   :  { %v191_v19 = vmul.f32 -1.442695, %v143_v17 }
 0x10c   :  { %v190_v20 = vmul.f32 -1.442695, %v142_v18 }
 0x10d   :  { %225 = vpow2.f32 %v191_v19 }
 0x10e   :  { %227 = vpow2.f32 %v190_v20 }
 0x117   :  { %v226_v21 = vpop.eup %225 }
 0x118   :  { %v228_v22 = vpop.eup %227  ;;  %v151_v23 = vadd.f32 1.0, %v226_v21 }
 0x119   :  { %v150_v24 = vadd.f32 1.0, %v228_v22 }
 0x11a   :  { %229 = vrcp.f32 %v151_v23 }
 0x11b   :  { %231 = vrcp.f32 %v150_v24 }
 0x124   :  { %v230_v25 = vpop.eup %229 }
 0x125   :  { %v232_v26 = vpop.eup %231  ;;  %v157_v27 = vmul.f32 2.0, %v230_v25  ;;  %v164_v30 = vsel %vm162_vm4, %v230_v25, %v135_v14 }
 0x126   :  { %v156_v28 = vmul.f32 2.0, %v232_v26  ;;  %v163_v33 = vsel %vm162_vm4, %v232_v26, %v130_v16 }
 0x127   :  { %v193_v29 = vadd.f32 -1.0, %v157_v27 }
 0x128   :  { %v192_v31 = vadd.f32 -1.0, %v156_v28 }
 0x129   :  { %v166_v32 = vsel %vm140_vm1, %v193_v29, %v164_v30 }
 0x12a   :  { %168 = vst [vmem:[#allocation7 + $0x8] sm:$0xff] %v166_v32  ;;  %v165_v34 = vsel %vm140_vm1, %v192_v31, %v163_v33 }
 0x12b   :  { %167 = vst [vmem:[#allocation7] sm:$0xff] %v165_v34 }
 0x12c   :  { %173 = vsyncadd [#allocation4], 128  ;;  %s310_s2 = smov [#allocation7]  }
 0x12d   :  { %s174_s12 = sshll.u32 %s310_s2, 4  ;;  %s175_s12 = int_to_ptr.vmem [resolvable:$true] %s174_s12 }
 0x12e   :  { %s277_s13 = scalar_lea.vmem %s175_s12, 128  ;;  %s281_s14 = scalar_lea.vmem %s175_s12, 256 }
 0x12f   :  { %p278_p2 = scmp.ne.s32.totalorder %s175_s12, %s277_s13  ;;  %p282_p3 = scmp.lt.s32.totalorder %s175_s12, %s175_s12 }
 0x130   :  { %p283_p4 = scmp.lt.s32.totalorder %s281_s14, %s277_s13 }
 0x132   :  { %p284_p5 = por %p283_p4, %p282_p3 }
 0x134   :  { %p285_p6 = pnand %p284_p5, %p278_p2 }
 0x136   :  { %288 = shalt.err (!%p285_p6)
}
 0x137   :  { %s289_s17 = scalar_lea.hbm %s385_s3, 128 }
 0x138   :  { %p290_p7 = scmp.ne.s32.totalorder %s385_s3, %s289_s17  ;;  %p293_p8 = scmp.lt.u32.totalorder %s289_s17, %s385_s3 }
 0x13a   :  { %p295_p9 = pnand %p293_p8, %p290_p7 }
 0x13c   :  { %298 = shalt.err (!%p295_p9)
}
 0x13d   :  { %180 = dma.vmem_to_hbm [thread:$0]  %s175_s12, 128, %s385_s3, [#allocation4], %s306_s23, %s306_s23, %s307_s24  }
 0x13e   :  { %303 = dma.done.wait [#allocation4], 256  }
 0x13f   :  { %304 = vsyncadd [#allocation4], 4294967040 }
 0x140   :  { %184 = vsyncpa [#allocation3], 1 }
 0x141   :  { %185 = vsyncpa [#allocation6], 1 }
 0x142   :  { %186 = vsyncpa [#allocation4], 1 }

</bundles_post_ra>
